<compile_context>
chip_gen: v5e
topology: v5e:2x2
jax: 0.10.0
libtpu: 0.0.40
codegen_flags: <defaults>
</compile_context>

<pallas_src>
import functools

import jax
import jax.numpy as jnp
from jax import lax
from jax.experimental import pallas as pl
from jax.experimental.pallas import tpu as pltpu

_LANES = 128


# --------------------------------------------------------------------------
# Kernel
# --------------------------------------------------------------------------
def _ensemble_kernel(xd_ref, x3_ref, wd_ref, w3_ref, o_ref, acc_ref, *,
                     kd_tiles, k3_tiles, k_half, kd, k3):
    """Grid = (split, batch_tiles, k_half).

    gk = split * k_half + k walks the fused reduction sequence
    [deit tiles 0..kd_tiles-1 | 3d tiles 0..k3_tiles-1].  Each grid step
    accumulates one activation tile of the active branch into a lane-dense
    (tm, 128) f32 accumulator; the cross-lane reduce happens once at the end.

    xd_ref : (tm, tkd)   deit activation tile
    x3_ref : (tm, tk3)   3d   activation tile
    wd_ref : (1,  tkd)   0.5-scaled deit weight row tile
    w3_ref : (1,  tk3)   0.5-scaled 3d   weight row tile
    o_ref  : (1, tm, 1)  partial output for this (split, batch-tile)
    acc_ref: (tm, 128)   f32 per-lane partial sums
    """
    c = pl.program_id(0)
    k = pl.program_id(2)
    gk = c * k_half + k                      # global K-tile index

    @pl.when(k == 0)
    def _init():
        acc_ref[...] = jnp.zeros_like(acc_ref)

    def _accumulate(x_ref, w_ref, tile_idx, k_total):
        tm, tk = x_ref.shape
        x = x_ref[...].astype(jnp.float32)           # (tm, tk)
        w = w_ref[...].astype(jnp.float32)           # (1, tk) sublane bcast
        prod = x * w
        if k_total % tk != 0:
            # Ragged last tile: columns past k_total hold garbage -> mask.
            col = lax.broadcasted_iota(jnp.int32, prod.shape, 1) + tile_idx * tk
            prod = jnp.where(col < k_total, prod, 0.0)
        # Lane-dense accumulation: fold the tile into (tm, 128) per-lane
        # partial sums with pure VPU adds; defer the cross-lane reduce.
        n_full = tk // _LANES
        rem = tk - n_full * _LANES
        acc = acc_ref[...]
        for s in range(n_full):
            acc = acc + prod[:, s * _LANES:(s + 1) * _LANES]
        if rem:
            tail = jnp.concatenate(
                [prod[:, n_full * _LANES:],
                 jnp.zeros((tm, _LANES - rem), jnp.float32)], axis=-1)
            acc = acc + tail
        acc_ref[...] = acc

    @pl.when(gk < kd_tiles)
    def _branch_deit():
        _accumulate(xd_ref, wd_ref, gk, kd)

    @pl.when(jnp.logical_and(gk >= kd_tiles, gk < kd_tiles + k3_tiles))
    def _branch_3d():
        _accumulate(x3_ref, w3_ref, gk - kd_tiles, k3)

    @pl.when(k == pl.num_programs(2) - 1)
    def _finalize():
        # Single cross-lane reduce per (split, batch-tile) pass.
        o_ref[0] = jnp.sum(acc_ref[...], axis=-1,
                           keepdims=True).astype(o_ref.dtype)


# --------------------------------------------------------------------------
# Parameter construction / one-time folding
# --------------------------------------------------------------------------
def make_params(key, f_deit, f_3d, num_outputs=1):
    """Deterministic synthetic parameters for the two sub-model heads."""
    k1, k2, k3, k4 = jax.random.split(key, 4)
    w_deit = jax.random.normal(k1, (f_deit, num_outputs), jnp.float32) * 0.02
    b_deit = jax.random.normal(k2, (1, num_outputs), jnp.float32) * 0.01
    w_3d = jax.random.normal(k3, (f_3d, num_outputs), jnp.float32) * 0.02
    b_3d = jax.random.normal(k4, (1, num_outputs), jnp.float32) * 0.01
    return (w_deit, b_deit, w_3d, b_3d)


def fold_params(params):
    """One-time fold (NOT per forward): bake the 0.5 ensemble-mean scale into
    each branch's weight, transpose to (O, K) row vectors, average the biases.
    The branch weights stay SEPARATE so the forward never concatenates or
    copies anything K-sized per call."""
    w_deit, b_deit, w_3d, b_3d = params
    wd_t = (0.5 * w_deit).T                  # (O, Kd)
    w3_t = (0.5 * w_3d).T                    # (O, K3)
    b = 0.5 * (b_deit + b_3d)                # (1, O)
    return wd_t, w3_t, b


def _pick_k_tiling(k_dim, target_tk):
    """(tile, n_tiles) for a reduction dim.  Small K -> one full-dim block
    (always layout-legal, no padding); large K -> lane-aligned streaming
    tiles with the ragged last tile masked in-kernel (no HBM padding)."""
    if k_dim <= target_tk:
        return k_dim, 1
    tk = max(_LANES, (target_tk // _LANES) * _LANES)
    return tk, pl.cdiv(k_dim, tk)


# --------------------------------------------------------------------------
# Forward
# --------------------------------------------------------------------------
@functools.partial(jax.jit,
                   static_argnames=("num_images", "target_tk", "n_split"))
def ensemble3d_deit_forward(x_3d, x_deit, folded_params, *, num_images=9,
                            target_tk=8192, n_split=2):
    """x_3d: (B, C, D, H, W), x_deit: (B, N, C, H, W); folded_params from
    fold_params()."""
    B, N, C, H, W = x_deit.shape
    assert N == num_images, f"Expected {num_images} images, got {N}"

    wd_t, w3_t, b = folded_params            # (1, Kd), (1, K3), (1, 1)
    # TODO(synk): num_outputs > 1 needs an MXU-dot path with O padded to 128
    # lanes; only the module-default num_outputs == 1 is implemented here.
    assert wd_t.shape[0] == 1 and w3_t.shape[0] == 1, "num_outputs == 1 only"

    # Flatten exactly as PyTorch .view on contiguous NCHW / NCDHW tensors.
    # Collapsing contiguous dims is free (no copy).
    xd = x_deit.reshape(B, -1)               # (B, Kd)
    x3 = x_3d.reshape(B, -1)                 # (B, K3)
    Kd, K3 = xd.shape[1], x3.shape[1]
    assert wd_t.shape[1] == Kd and w3_t.shape[1] == K3

    # ---- tiling -----------------------------------------------------------
    # Batch: full-dim block for small B (no padding/masking, legal for any
    # B); large B is tiled at 128 rows (boundary rows are garbage-in /
    # garbage-out on independent rows and get dropped on writeback).
    tm = B if B <= 256 else 128
    batch_tiles = pl.cdiv(B, tm)

    # K tiles: biggest lane-aligned tile keeping the two double-buffered
    # activation inputs within ~28 MiB of VMEM (2 inputs x 2 buffers x tm x
    # tk x 4B), capped at target_tk.  4-8 MiB-class tiles amortize the
    # per-grid-step overhead on v7x; plenty for v5e / v6e as well.
    tk_cap = max(_LANES,
                 (((28 * 1024 * 1024) // (16 * tm)) // _LANES) * _LANES)
    target = min(target_tk, tk_cap)
    tkd, kd_tiles = _pick_k_tiling(Kd, target)
    tk3, k3_tiles = _pick_k_tiling(K3, target)

    total_k = kd_tiles + k3_tiles            # fused reduction sequence
    k_half = pl.cdiv(total_k, n_split)       # split-K across TensorCores
    grid = (n_split, batch_tiles, k_half)    # K (reduction) axis is LAST

    # Clamped index maps: the inactive branch's block index stays constant,
    # so Pallas does not re-DMA it; overflow steps (odd total_k) stay
    # in-bounds and are skipped inside the kernel.
    def _xd_idx(c, i, k):
        return (i, jnp.minimum(c * k_half + k, kd_tiles - 1))

    def _x3_idx(c, i, k):
        j = c * k_half + k - kd_tiles
        return (i, jnp.minimum(jnp.maximum(j, 0), k3_tiles - 1))

    def _wd_idx(c, i, k):
        return (0, _xd_idx(c, i, k)[1])

    def _w3_idx(c, i, k):
        return (0, _x3_idx(c, i, k)[1])

    kernel = functools.partial(_ensemble_kernel, kd_tiles=kd_tiles,
                               k3_tiles=k3_tiles, k_half=k_half, kd=Kd, k3=K3)

    cost = pl.CostEstimate(
        flops=2 * B * (Kd + K3),
        transcendentals=0,
        bytes_accessed=4 * (B * (Kd + K3) + batch_tiles * (Kd + K3)
                            + n_split * B),
    )

    partials = pl.pallas_call(
        kernel,
        out_shape=jax.ShapeDtypeStruct((n_split, B, 1), jnp.float32),
        grid_spec=pltpu.PrefetchScalarGridSpec(
            num_scalar_prefetch=0,
            grid=grid,
            in_specs=[
                pl.BlockSpec((tm, tkd), _xd_idx),   # deit activations
                pl.BlockSpec((tm, tk3), _x3_idx),   # 3d   activations
                pl.BlockSpec((1, tkd), _wd_idx),    # deit weights (0.5-scaled)
                pl.BlockSpec((1, tk3), _w3_idx),    # 3d   weights (0.5-scaled)
            ],
            out_specs=pl.BlockSpec((1, tm, 1), lambda c, i, k: (c, i, 0)),
            scratch_shapes=[pltpu.VMEM((tm, _LANES), jnp.float32)],
        ),
        compiler_params=pltpu.CompilerParams(
            dimension_semantics=("parallel", "parallel", "arbitrary"),
            vmem_limit_bytes=48 * 1024 * 1024,
        ),
        cost_estimate=cost,
    )(xd, x3, wd_t, w3_t)

    # Sum the split-K partials and add the pre-averaged bias: a (n_split, B)
    # epilogue, negligible next to the B*K activation stream.
    out = partials.sum(axis=0)[:, 0] + b[0, 0]
    # final_output = stack([out_deit, out_3d]).mean(0) with each .view(-1)
    return out.reshape(-1)


# --------------------------------------------------------------------------
# Demo / correctness check
# --------------------------------------------------------------------------
if __name__ == "__main__":
    # Small shapes consistent with the module's forward contract.
    B = 2
    N = 9            # num_images (asserted in forward)
    C = 3
    H = W = 8
    D = 9            # depth for the 3D branch
    num_outputs = 1

    key = jax.random.PRNGKey(0)
    kx1, kx2, kp = jax.random.split(key, 3)

    x_deit = jax.random.normal(kx1, (B, N, C, H, W), jnp.float32)
    x_3d = jax.random.normal(kx2, (B, C, D, H, W), jnp.float32)

    f_deit = N * C * H * W
    f_3d = C * D * H * W
    raw_params = make_params(kp, f_deit, f_3d, num_outputs)
    folded = fold_params(raw_params)         # one-time fold, not per call

    out = ensemble3d_deit_forward(x_3d, x_deit, folded, num_images=N)
    out = jax.block_until_ready(out)

    # Pure-JAX reference against the ORIGINAL (unfolded) module semantics.
    w_deit, b_deit, w_3d, b_3d = raw_params
    ref_deit = (x_deit.reshape(B, -1) @ w_deit + b_deit).reshape(-1)
    ref_3d = (x_3d.reshape(B, -1) @ w_3d + b_3d).reshape(-1)
    ref = jnp.stack([ref_deit, ref_3d], axis=0).mean(axis=0)

    assert out.shape == (B * num_outputs,), out.shape
    assert jnp.allclose(out, ref, atol=2e-4, rtol=2e-4), (out, ref)

    print("KERNEL_OK")
</pallas_src>

<mosaic_0001>
module attributes {stable_mosaic.version = 11 : i64} {
  func.func @_ensemble_kernel(%arg0: i32, %arg1: i32, %arg2: i32, %arg3: memref<2x1728xf32, #tpu.memory_space<vmem>>, %arg4: memref<2x1728xf32, #tpu.memory_space<vmem>>, %arg5: memref<1x1728xf32, #tpu.memory_space<vmem>>, %arg6: memref<1x1728xf32, #tpu.memory_space<vmem>>, %arg7: memref<1x2x1xf32, #tpu.memory_space<vmem>>, %arg8: memref<2x128xf32, #tpu.memory_space<vmem>>) attributes {dimension_semantics = [#tpu.dimension_semantics<parallel>, #tpu.dimension_semantics<parallel>, #tpu.dimension_semantics<arbitrary>], iteration_bounds = array<i64: 2, 1, 1>, scalar_prefetch = 0 : i64, scratch_operands = 1 : i64, tpu.core_type = #tpu.core_type<tc>, window_params = [{transform_indices = @transform_0, window_bounds = array<i64: 2, 1728>}, {transform_indices = @transform_1, window_bounds = array<i64: 2, 1728>}, {transform_indices = @transform_2, window_bounds = array<i64: 1, 1728>}, {transform_indices = @transform_3, window_bounds = array<i64: 1, 1728>}, {transform_indices = @transform_4, window_bounds = array<i64: 1, 2, 1>}]} {
    %c1_i32 = arith.constant 1 : i32
    %0 = arith.muli %arg0, %c1_i32 : i32
    %1 = arith.addi %0, %arg2 : i32
    %c0_i32 = arith.constant 0 : i32
    %2 = arith.cmpi eq, %arg2, %c0_i32 : i32
    %3 = arith.extui %2 : i1 to i32
    %c0_i32_0 = arith.constant 0 : i32
    %4 = arith.cmpi ne, %3, %c0_i32_0 : i32
    scf.if %4 {
      %cst = arith.constant 0.000000e+00 : f32
      %16 = vector.broadcast %cst : f32 to vector<2x128xf32>
      %c0 = arith.constant 0 : index
      %c0_7 = arith.constant 0 : index
      %17 = vector.load %arg8[%c0, %c0_7] : memref<2x128xf32, #tpu.memory_space<vmem>>, vector<2x128xf32>
      tpu.vector_store %arg8[%c0, %c0_7], %16 {strides = array<i32>} : memref<2x128xf32, #tpu.memory_space<vmem>>, vector<2x128xf32>,
    } else {
    }
    %c1_i32_1 = arith.constant 1 : i32
    %5 = arith.cmpi slt, %1, %c1_i32_1 : i32
    %6 = arith.extui %5 : i1 to i32
    %c0_i32_2 = arith.constant 0 : i32
    %7 = arith.cmpi ne, %6, %c0_i32_2 : i32
    scf.if %7 {
      %c0 = arith.constant 0 : index
      %c0_7 = arith.constant 0 : index
      %16 = vector.load %arg3[%c0, %c0_7] : memref<2x1728xf32, #tpu.memory_space<vmem>>, vector<2x1728xf32>
      %c0_8 = arith.constant 0 : index
      %c0_9 = arith.constant 0 : index
      %17 = vector.load %arg5[%c0_8, %c0_9] : memref<1x1728xf32, #tpu.memory_space<vmem>>, vector<1x1728xf32>
      %18 = vector.broadcast %17 : vector<1x1728xf32> to vector<2x1728xf32>
      %19 = arith.mulf %16, %18 : vector<2x1728xf32>
      %c0_10 = arith.constant 0 : index
      %c0_11 = arith.constant 0 : index
      %20 = vector.load %arg8[%c0_10, %c0_11] : memref<2x128xf32, #tpu.memory_space<vmem>>, vector<2x128xf32>
      %21 = vector.extract_strided_slice %19 {offsets = [0, 0], sizes = [2, 128], strides = [1, 1]} : vector<2x1728xf32> to vector<2x128xf32>
      %22 = arith.addf %20, %21 : vector<2x128xf32>
      %23 = vector.extract_strided_slice %19 {offsets = [0, 128], sizes = [2, 128], strides = [1, 1]} : vector<2x1728xf32> to vector<2x128xf32>
      %24 = arith.addf %22, %23 : vector<2x128xf32>
      %25 = vector.extract_strided_slice %19 {offsets = [0, 256], sizes = [2, 128], strides = [1, 1]} : vector<2x1728xf32> to vector<2x128xf32>
      %26 = arith.addf %24, %25 : vector<2x128xf32>
      %27 = vector.extract_strided_slice %19 {offsets = [0, 384], sizes = [2, 128], strides = [1, 1]} : vector<2x1728xf32> to vector<2x128xf32>
      %28 = arith.addf %26, %27 : vector<2x128xf32>
      %29 = vector.extract_strided_slice %19 {offsets = [0, 512], sizes = [2, 128], strides = [1, 1]} : vector<2x1728xf32> to vector<2x128xf32>
      %30 = arith.addf %28, %29 : vector<2x128xf32>
      %31 = vector.extract_strided_slice %19 {offsets = [0, 640], sizes = [2, 128], strides = [1, 1]} : vector<2x1728xf32> to vector<2x128xf32>
      %32 = arith.addf %30, %31 : vector<2x128xf32>
      %33 = vector.extract_strided_slice %19 {offsets = [0, 768], sizes = [2, 128], strides = [1, 1]} : vector<2x1728xf32> to vector<2x128xf32>
      %34 = arith.addf %32, %33 : vector<2x128xf32>
      %35 = vector.extract_strided_slice %19 {offsets = [0, 896], sizes = [2, 128], strides = [1, 1]} : vector<2x1728xf32> to vector<2x128xf32>
      %36 = arith.addf %34, %35 : vector<2x128xf32>
      %37 = vector.extract_strided_slice %19 {offsets = [0, 1024], sizes = [2, 128], strides = [1, 1]} : vector<2x1728xf32> to vector<2x128xf32>
      %38 = arith.addf %36, %37 : vector<2x128xf32>
      %39 = vector.extract_strided_slice %19 {offsets = [0, 1152], sizes = [2, 128], strides = [1, 1]} : vector<2x1728xf32> to vector<2x128xf32>
      %40 = arith.addf %38, %39 : vector<2x128xf32>
      %41 = vector.extract_strided_slice %19 {offsets = [0, 1280], sizes = [2, 128], strides = [1, 1]} : vector<2x1728xf32> to vector<2x128xf32>
      %42 = arith.addf %40, %41 : vector<2x128xf32>
      %43 = vector.extract_strided_slice %19 {offsets = [0, 1408], sizes = [2, 128], strides = [1, 1]} : vector<2x1728xf32> to vector<2x128xf32>
      %44 = arith.addf %42, %43 : vector<2x128xf32>
      %45 = vector.extract_strided_slice %19 {offsets = [0, 1536], sizes = [2, 128], strides = [1, 1]} : vector<2x1728xf32> to vector<2x128xf32>
      %46 = arith.addf %44, %45 : vector<2x128xf32>
      %47 = vector.extract_strided_slice %19 {offsets = [0, 1664], sizes = [2, 64], strides = [1, 1]} : vector<2x1728xf32> to vector<2x64xf32>
      %cst = arith.constant 0.000000e+00 : f32
      %48 = vector.broadcast %cst : f32 to vector<2x64xf32>
      %49 = tpu.concatenate %47, %48 in 1 : vector<2x64xf32>, vector<2x64xf32> -> vector<2x128xf32>
      %50 = arith.addf %46, %49 : vector<2x128xf32>
      %c0_12 = arith.constant 0 : index
      %c0_13 = arith.constant 0 : index
      %51 = vector.load %arg8[%c0_12, %c0_13] : memref<2x128xf32, #tpu.memory_space<vmem>>, vector<2x128xf32>
      tpu.vector_store %arg8[%c0_12, %c0_13], %50 {strides = array<i32>} : memref<2x128xf32, #tpu.memory_space<vmem>>, vector<2x128xf32>,
    } else {
    }
    %c1_i32_3 = arith.constant 1 : i32
    %8 = arith.cmpi sge, %1, %c1_i32_3 : i32
    %c2_i32 = arith.constant 2 : i32
    %9 = arith.cmpi slt, %1, %c2_i32 : i32
    %10 = arith.andi %8, %9 : i1
    %11 = arith.extui %10 : i1 to i32
    %c0_i32_4 = arith.constant 0 : i32
    %12 = arith.cmpi ne, %11, %c0_i32_4 : i32
    scf.if %12 {
      %c0 = arith.constant 0 : index
      %c0_7 = arith.constant 0 : index
      %16 = vector.load %arg4[%c0, %c0_7] : memref<2x1728xf32, #tpu.memory_space<vmem>>, vector<2x1728xf32>
      %c0_8 = arith.constant 0 : index
      %c0_9 = arith.constant 0 : index
      %17 = vector.load %arg6[%c0_8, %c0_9] : memref<1x1728xf32, #tpu.memory_space<vmem>>, vector<1x1728xf32>
      %18 = vector.broadcast %17 : vector<1x1728xf32> to vector<2x1728xf32>
      %19 = arith.mulf %16, %18 : vector<2x1728xf32>
      %c0_10 = arith.constant 0 : index
      %c0_11 = arith.constant 0 : index
      %20 = vector.load %arg8[%c0_10, %c0_11] : memref<2x128xf32, #tpu.memory_space<vmem>>, vector<2x128xf32>
      %21 = vector.extract_strided_slice %19 {offsets = [0, 0], sizes = [2, 128], strides = [1, 1]} : vector<2x1728xf32> to vector<2x128xf32>
      %22 = arith.addf %20, %21 : vector<2x128xf32>
      %23 = vector.extract_strided_slice %19 {offsets = [0, 128], sizes = [2, 128], strides = [1, 1]} : vector<2x1728xf32> to vector<2x128xf32>
      %24 = arith.addf %22, %23 : vector<2x128xf32>
      %25 = vector.extract_strided_slice %19 {offsets = [0, 256], sizes = [2, 128], strides = [1, 1]} : vector<2x1728xf32> to vector<2x128xf32>
      %26 = arith.addf %24, %25 : vector<2x128xf32>
      %27 = vector.extract_strided_slice %19 {offsets = [0, 384], sizes = [2, 128], strides = [1, 1]} : vector<2x1728xf32> to vector<2x128xf32>
      %28 = arith.addf %26, %27 : vector<2x128xf32>
      %29 = vector.extract_strided_slice %19 {offsets = [0, 512], sizes = [2, 128], strides = [1, 1]} : vector<2x1728xf32> to vector<2x128xf32>
      %30 = arith.addf %28, %29 : vector<2x128xf32>
      %31 = vector.extract_strided_slice %19 {offsets = [0, 640], sizes = [2, 128], strides = [1, 1]} : vector<2x1728xf32> to vector<2x128xf32>
      %32 = arith.addf %30, %31 : vector<2x128xf32>
      %33 = vector.extract_strided_slice %19 {offsets = [0, 768], sizes = [2, 128], strides = [1, 1]} : vector<2x1728xf32> to vector<2x128xf32>
      %34 = arith.addf %32, %33 : vector<2x128xf32>
      %35 = vector.extract_strided_slice %19 {offsets = [0, 896], sizes = [2, 128], strides = [1, 1]} : vector<2x1728xf32> to vector<2x128xf32>
      %36 = arith.addf %34, %35 : vector<2x128xf32>
      %37 = vector.extract_strided_slice %19 {offsets = [0, 1024], sizes = [2, 128], strides = [1, 1]} : vector<2x1728xf32> to vector<2x128xf32>
      %38 = arith.addf %36, %37 : vector<2x128xf32>
      %39 = vector.extract_strided_slice %19 {offsets = [0, 1152], sizes = [2, 128], strides = [1, 1]} : vector<2x1728xf32> to vector<2x128xf32>
      %40 = arith.addf %38, %39 : vector<2x128xf32>
      %41 = vector.extract_strided_slice %19 {offsets = [0, 1280], sizes = [2, 128], strides = [1, 1]} : vector<2x1728xf32> to vector<2x128xf32>
      %42 = arith.addf %40, %41 : vector<2x128xf32>
      %43 = vector.extract_strided_slice %19 {offsets = [0, 1408], sizes = [2, 128], strides = [1, 1]} : vector<2x1728xf32> to vector<2x128xf32>
      %44 = arith.addf %42, %43 : vector<2x128xf32>
      %45 = vector.extract_strided_slice %19 {offsets = [0, 1536], sizes = [2, 128], strides = [1, 1]} : vector<2x1728xf32> to vector<2x128xf32>
      %46 = arith.addf %44, %45 : vector<2x128xf32>
      %47 = vector.extract_strided_slice %19 {offsets = [0, 1664], sizes = [2, 64], strides = [1, 1]} : vector<2x1728xf32> to vector<2x64xf32>
      %cst = arith.constant 0.000000e+00 : f32
      %48 = vector.broadcast %cst : f32 to vector<2x64xf32>
      %49 = tpu.concatenate %47, %48 in 1 : vector<2x64xf32>, vector<2x64xf32> -> vector<2x128xf32>
      %50 = arith.addf %46, %49 : vector<2x128xf32>
      %c0_12 = arith.constant 0 : index
      %c0_13 = arith.constant 0 : index
      %51 = vector.load %arg8[%c0_12, %c0_13] : memref<2x128xf32, #tpu.memory_space<vmem>>, vector<2x128xf32>
      tpu.vector_store %arg8[%c0_12, %c0_13], %50 {strides = array<i32>} : memref<2x128xf32, #tpu.memory_space<vmem>>, vector<2x128xf32>,
    } else {
    }
    %c0_i32_5 = arith.constant 0 : i32
    %13 = arith.cmpi eq, %arg2, %c0_i32_5 : i32
    %14 = arith.extui %13 : i1 to i32
    %c0_i32_6 = arith.constant 0 : i32
    %15 = arith.cmpi ne, %14, %c0_i32_6 : i32
    scf.if %15 {
      %c0 = arith.constant 0 : index
      %c0_7 = arith.constant 0 : index
      %16 = vector.load %arg8[%c0, %c0_7] : memref<2x128xf32, #tpu.memory_space<vmem>>, vector<2x128xf32>
      %cst = arith.constant dense<0.000000e+00> : vector<2xf32>
      %17 = vector.multi_reduction <add>, %16, %cst [1] : vector<2x128xf32> to vector<2xf32>
      %18 = vector.shape_cast %17 : vector<2xf32> to vector<2x1xf32>
      %c0_8 = arith.constant 0 : index
      %c0_9 = arith.constant 0 : index
      %c0_10 = arith.constant 0 : index
      %19 = vector.load %arg7[%c0_8, %c0_9, %c0_10] : memref<1x2x1xf32, #tpu.memory_space<vmem>>, vector<1x2x1xf32>
      %20 = vector.shape_cast %19 : vector<1x2x1xf32> to vector<2x1xf32>
      %21 = vector.shape_cast %18 : vector<2x1xf32> to vector<1x2x1xf32>
      tpu.vector_store %arg7[%c0_8, %c0_9, %c0_10], %21 {strides = array<i32>} : memref<1x2x1xf32, #tpu.memory_space<vmem>>, vector<1x2x1xf32>,
    } else {
    }
    return
  }
  func.func @transform_0(%arg0: i32, %arg1: i32, %arg2: i32) -> (i32, i32) {
    %c1_i32 = arith.constant 1 : i32
    %0 = arith.muli %arg0, %c1_i32 : i32
    %1 = arith.addi %0, %arg2 : i32
    %c0_i32 = arith.constant 0 : i32
    %2 = arith.minsi %1, %c0_i32 : i32
    %c0_i32_0 = arith.constant 0 : i32
    return %arg1, %2 : i32, i32
  }
  func.func @transform_1(%arg0: i32, %arg1: i32, %arg2: i32) -> (i32, i32) {
    %c1_i32 = arith.constant 1 : i32
    %0 = arith.muli %arg0, %c1_i32 : i32
    %1 = arith.addi %0, %arg2 : i32
    %c1_i32_0 = arith.constant 1 : i32
    %2 = arith.subi %1, %c1_i32_0 : i32
    %c0_i32 = arith.constant 0 : i32
    %3 = arith.maxsi %2, %c0_i32 : i32
    %c0_i32_1 = arith.constant 0 : i32
    %4 = arith.minsi %3, %c0_i32_1 : i32
    %c0_i32_2 = arith.constant 0 : i32
    return %arg1, %4 : i32, i32
  }
  func.func @transform_2(%arg0: i32, %arg1: i32, %arg2: i32) -> (i32, i32) {
    %c1_i32 = arith.constant 1 : i32
    %0 = arith.muli %arg0, %c1_i32 : i32
    %1 = arith.addi %0, %arg2 : i32
    %c0_i32 = arith.constant 0 : i32
    %2 = arith.minsi %1, %c0_i32 : i32
    %c0_i32_0 = arith.constant 0 : i32
    %c0_i32_1 = arith.constant 0 : i32
    return %c0_i32_0, %2 : i32, i32
  }
  func.func @transform_3(%arg0: i32, %arg1: i32, %arg2: i32) -> (i32, i32) {
    %c1_i32 = arith.constant 1 : i32
    %0 = arith.muli %arg0, %c1_i32 : i32
    %1 = arith.addi %0, %arg2 : i32
    %c1_i32_0 = arith.constant 1 : i32
    %2 = arith.subi %1, %c1_i32_0 : i32
    %c0_i32 = arith.constant 0 : i32
    %3 = arith.maxsi %2, %c0_i32 : i32
    %c0_i32_1 = arith.constant 0 : i32
    %4 = arith.minsi %3, %c0_i32_1 : i32
    %c0_i32_2 = arith.constant 0 : i32
    %c0_i32_3 = arith.constant 0 : i32
    return %c0_i32_2, %4 : i32, i32
  }
  func.func @transform_4(%arg0: i32, %arg1: i32, %arg2: i32) -> (i32, i32, i32) {
    %c0_i32 = arith.constant 0 : i32
    %c0_i32_0 = arith.constant 0 : i32
    return %arg0, %arg1, %c0_i32 : i32, i32, i32
  }
}

</mosaic_0001>

<bundles_post_ra>
// kernel: ensemble3d_deit_forward.1
= control target key start
LH: loop header
LB: loop body
LE: loop exit
PB: predicated region body
PF: predicated region fallthrough
CT: control target
= control target key end

     0   :  { %s913_s15 = smov 0   ;;  %s915_s16 = smov 0   ;;  %s1012_s0 = inlined_call_operand.vmem [shape: f32[2,1728], index: 0, kind: input, shape index: {}]   ;;  %s1013_s1 = inlined_call_operand.vmem [shape: f32[2,1728], index: 1, kind: input, shape index: {}]   ;;  %s1014_s2 = inlined_call_operand.vmem [shape: f32[1,1728], index: 2, kind: input, shape index: {}]   ;;  %s1015_s3 = inlined_call_operand.vmem [shape: f32[1,1728], index: 3, kind: input, shape index: {}]   ;;  %s1016_s4 = inlined_call_operand.vmem [shape: f32[2,2,1], index: 4, kind: output, shape index: {}]  }
   0x1   :  { %s917_s17 = smov 0  }
   0x2 LB: > { %s33_s18 = sadd.s32 1, %s881_s16  ;;  %p819_p0 = scmp.ge.s32.totalorder %s885_s17, 1  ;;  %s885_s17 = sphi %s917_s17, %s14_s17   ;;  %s881_s16 = sphi %s915_s16, %s1018_s16   ;;  %s877_s15 = sphi %s913_s15, %s1017_s15  }
   0x3   : > { %p35_p1 = scmp.ge.s32.totalorder %s33_s18, 2  ;;  %p299_p2 = scmp.lt.s32.totalorder %s885_s17, 3 }
   0x5   : > { %s1020_s18 = smov (%p35_p1, %s33_s18), 0  ;;  %p300_p3 = pnand %p819_p0, %p299_p2 }
   0x6   : > { %p367_p4 = scmp.lt.s32.totalorder (!%p300_p3), %s877_s15, 0  ;;  %p432_p5 = scmp.lt.s32.totalorder (!%p300_p3), %s877_s15, 1 }
   0x7   : > { %303 = sbr.rel (%p300_p3) target bundleno = 342 (0x156), region = 36  ;;  %p835_p7 = scmp.ge.s32.totalorder (!%p300_p3), %s877_s15, 1 }
   0xc   : > { %v887_v0 = vmov 0.0   ;;  %s368_s19 = scalar_select %p367_p4, %s877_s15, 0 }
   0xd   : > { %444 = vst [vmem:[#allocation2] sm:$0x3] %v887_v0  ;;  %s433_s20 = scalar_select %p432_p5, %s877_s15, 1 }
   0xe   : > { %s369_s21 = smul.u32 14, %s368_s19 }
   0xf   : > { %s834_s22 = sshll.u32 %s433_s20, 1 }
  0x10   : > { %p372_p6 = scmp.lt.s32.totalorder %s369_s21, 13  ;;  %s940_s25 = scalar_lea.vmem %s1016_s4, %s834_s22 }
  0x11   : > { %448 = sbr.rel (%p835_p7) target bundleno = 115 (0x73), region = 44 }
  0x12   : > { %s1022_s21 = smov (!%p372_p6, %s369_s21), 13 }
  0x13   : > { %s820_s26 = sshll.u32 %s1022_s21, 1  ;;  %s945_s29 = scalar_lea.vmem %s1014_s2, %s1022_s21 }
  0x14   : > { %s950_s6 = scalar_lea.vmem %s1012_s0, %s820_s26 }
  0x16   : > { %v453_v1 = vld [vmem:[%s945_s29] sm:$0xff]  ;;  %vm481_vm0 = vcmask 1041408   ;;  %vm483_vm1 = vcmask 1045508   ;;  %vm485_vm2 = vcmask 1043456   ;;  %v450_v25 = vld [vmem:[%s950_s6 + $0x8] sm:$0xff]  ;;  %v451_v41 = vld [vmem:[%s950_s6 + $0x10] sm:$0xff] }
  0x17   : > { %v457_v2 = vperm.slane %v453_v1, 0  ;;  %v458_v3 = vperm.slane %v453_v1, 1  ;;  %v459_v4 = vperm.slane %v453_v1, 2  ;;  %v460_v5 = vperm.slane %v453_v1, 3  ;;  %v449_v9 = vld [vmem:[%s950_s6] sm:$0xff] }
  0x18   : > { %v462_v14 = vperm.slane %v453_v1, 5  ;;  %v463_v15 = vperm.slane %v453_v1, 6  ;;  %v464_v16 = vperm.slane %v453_v1, 7  ;;  %v461_v18 = vperm.slane %v453_v1, 4  ;;  %v454_v29 = vld [vmem:[%s945_s29 + $0x8] sm:$0x3f] }
  0x19   : > { %v471_v6 = vrot.slane %v458_v3, 6  ;;  %v472_v7 = vrot.slane %v459_v4, 4  ;;  %v473_v8 = vrot.slane %v460_v5, 2  ;;  %v466_v30 = vperm.slane %v454_v29, 1  ;;  %v502_v44 = vld [vmem:[#allocation2] sm:$0x3] }
  0x1a   : > { %v474_v19 = vrot.slane %v462_v14, 6  ;;  %v475_v20 = vrot.slane %v463_v15, 4  ;;  %v476_v21 = vrot.slane %v464_v16, 2  ;;  %v467_v31 = vperm.slane %v454_v29, 2  ;;  %v452_v58 = vld [vmem:[%s950_s6 + $0x18] sm:$0xf] }
  0x1b   : > { %v482_v10 = vsel %vm481_vm0, %v457_v2, %v471_v6  ;;  %v484_v11 = vsel %vm483_vm1, %v472_v7, %v473_v8  ;;  %v468_v32 = vperm.slane %v454_v29, 3  ;;  %v465_v34 = vperm.slane %v454_v29, 0 }
  0x1c   : > { %v486_v12 = vsel %vm485_vm2, %v482_v10, %v484_v11  ;;  %v487_v22 = vsel %vm481_vm0, %v461_v18, %v474_v19  ;;  %v488_v23 = vsel %vm483_vm1, %v475_v20, %v476_v21  ;;  %v477_v35 = vrot.slane %v466_v30, 6 }
  0x1d   : > { %v498_v13 = vmul.f32 %v486_v12, %v449_v9  ;;  %v489_v26 = vsel %vm485_vm2, %v487_v22, %v488_v23  ;;  %v478_v36 = vrot.slane %v467_v31, 4  ;;  %v479_v37 = vrot.slane %v468_v32, 2 }
  0x1e   : > { %v499_v27 = vmul.f32 %v489_v26, %v450_v25  ;;  %v490_v38 = vsel %vm481_vm0, %v465_v34, %v477_v35  ;;  %v470_v51 = vperm.slane %v454_v29, 5  ;;  %v469_v53 = vperm.slane %v454_v29, 4 }
  0x1f   : > { %505 = vst [vmem:[#allocation1] ss:$4 sm:$0xff] %v498_v13  ;;  %v491_v39 = vsel %vm483_vm1, %v478_v36, %v479_v37  ;;  %v503_v46 = vadd.f32 %v502_v44, %v498_v13  ;;  %vm550_vm3 = vcmask 523264  }
  0x20   : > { %v492_v42 = vsel %vm485_vm2, %v490_v38, %v491_v39  ;;  %v480_v54 = vrot.slane %v470_v51, 6 }
  0x21   : > { %v500_v43 = vmul.f32 %v492_v42, %v451_v41 }
  0x22   : > { %v493_v59 = vsel %vm481_vm0, %v469_v53, %v480_v54 }
  0x23   : > { %v501_v61 = vmul.f32 %v493_v59, %v452_v58 }
  0x26   : > { %v506_v17 = vld.sshfl [vmem:[#allocation1 + $0x8] sm:$0xff pattern:$0x73625140] }
  0x27   : > { %509 = vst [vmem:[#allocation1] ss:$4 sm:$0xff] %v498_v13  ;;  %v508_v47 = vadd.f32 %v506_v17, %v503_v46 }
  0x2e   : > { %v510_v24 = vld.sshfl [vmem:[#allocation1 + $0x10] sm:$0xff pattern:$0x73625140] }
  0x2f   : > { %513 = vst [vmem:[#allocation1] ss:$4 sm:$0xff] %v498_v13  ;;  %v512_v48 = vadd.f32 %v510_v24, %v508_v47 }
  0x36   : > { %v514_v28 = vld.sshfl [vmem:[#allocation1 + $0x18] sm:$0xff pattern:$0x73625140] }
  0x37   : > { %519 = vst [vmem:[#allocation1] ss:$4 sm:$0xff] %v499_v27  ;;  %v516_v50 = vadd.f32 %v514_v28, %v512_v48 }
  0x39   : > { %v517_v52 = vadd.f32 %v516_v50, %v499_v27 }
  0x3e   : > { %v520_v33 = vld.sshfl [vmem:[#allocation1 + $0x8] sm:$0xff pattern:$0x73625140] }
  0x3f   : > { %523 = vst [vmem:[#allocation1] ss:$4 sm:$0xff] %v499_v27  ;;  %v522_v55 = vadd.f32 %v520_v33, %v517_v52 }
  0x46   : > { %v524_v40 = vld.sshfl [vmem:[#allocation1 + $0x10] sm:$0xff pattern:$0x73625140] }
  0x47   : > { %527 = vst [vmem:[#allocation1] ss:$4 sm:$0xff] %v499_v27  ;;  %v526_v57 = vadd.f32 %v524_v40, %v522_v55 }
  0x4e   : > { %v528_v45 = vld.sshfl [vmem:[#allocation1 + $0x18] sm:$0xff pattern:$0x73625140] }
  0x4f   : > { %533 = vst [vmem:[#allocation1] ss:$4 sm:$0xff] %v500_v43  ;;  %v530_v60 = vadd.f32 %v528_v45, %v526_v57 }
  0x51   : > { %v531_v62 = vadd.f32 %v530_v60, %v500_v43 }
  0x56   : > { %v534_v49 = vld.sshfl [vmem:[#allocation1 + $0x8] sm:$0xff pattern:$0x73625140] }
  0x57   : > { %537 = vst [vmem:[#allocation1] ss:$4 sm:$0xff] %v500_v43  ;;  %v536_v0 = vadd.f32 %v534_v49, %v531_v62 }
  0x5e   : > { %v538_v56 = vld.sshfl [vmem:[#allocation1 + $0x10] sm:$0xff pattern:$0x73625140] }
  0x5f   : > { %541 = vst [vmem:[#allocation1] ss:$4 sm:$0xff] %v500_v43  ;;  %v540_v1 = vadd.f32 %v538_v56, %v536_v0 }
  0x66   : > { %v542_v63 = vld.sshfl [vmem:[#allocation1 + $0x18] sm:$0xff pattern:$0x73625140] }
  0x67   : > { %547 = vst [vmem:[#allocation1] ss:$4 sm:$0xff] %v501_v61  ;;  %v544_v2 = vadd.f32 %v542_v63, %v540_v1 }
  0x69   : > { %v545_v3 = vadd.f32 %v544_v2, %v501_v61 }
  0x6e   : > { %v548_v4 = vld.sshfl [vmem:[#allocation1 + $0x8] sm:$0xff pattern:$0x73625140] }
  0x6f   : > { %v551_v5 = vsel %vm550_vm3, %v548_v4, 0.0 }
  0x70   : > { %v552_v6 = vadd.f32 %v551_v5, %v545_v3 }
  0x72   : > { %553 = vst [vmem:[#allocation2] sm:$0x3] %v552_v6 }
  0x73 PF: > { %p555_p8 = scmp.lt.s32.totalorder %s877_s15, 2 }
  0x75   : > { %p556_p9 = pnand %p835_p7, %p555_p8 }
  0x77   : > { %559 = sbr.rel (%p556_p9) target bundleno = 217 (0xd9), region = 48 }
  0x7c   : > { %v564_v7 = vld [vmem:[%s1015_s3] sm:$0xff]  ;;  %vm592_vm4 = vcmask 1041408   ;;  %vm594_vm5 = vcmask 1045508   ;;  %vm596_vm6 = vcmask 1043456   ;;  %v561_v31 = vld [vmem:[%s1013_s1 + $0x8] sm:$0xff]  ;;  %v562_v47 = vld [vmem:[%s1013_s1 + $0x10] sm:$0xff] }
  0x7d   : > { %v568_v8 = vperm.slane %v564_v7, 0  ;;  %v569_v9 = vperm.slane %v564_v7, 1  ;;  %v570_v10 = vperm.slane %v564_v7, 2  ;;  %v571_v11 = vperm.slane %v564_v7, 3  ;;  %v560_v15 = vld [vmem:[%s1013_s1] sm:$0xff] }
  0x7e   : > { %v573_v20 = vperm.slane %v564_v7, 5  ;;  %v574_v21 = vperm.slane %v564_v7, 6  ;;  %v575_v22 = vperm.slane %v564_v7, 7  ;;  %v572_v24 = vperm.slane %v564_v7, 4  ;;  %v565_v35 = vld [vmem:[%s1015_s3 + $0x8] sm:$0x3f] }
  0x7f   : > { %v582_v12 = vrot.slane %v569_v9, 6  ;;  %v583_v13 = vrot.slane %v570_v10, 4  ;;  %v584_v14 = vrot.slane %v571_v11, 2  ;;  %v577_v36 = vperm.slane %v565_v35, 1  ;;  %v613_v50 = vld [vmem:[#allocation2] sm:$0x3] }
  0x80   : > { %v585_v25 = vrot.slane %v573_v20, 6  ;;  %v586_v26 = vrot.slane %v574_v21, 4  ;;  %v587_v27 = vrot.slane %v575_v22, 2  ;;  %v578_v37 = vperm.slane %v565_v35, 2  ;;  %v563_v0 = vld [vmem:[%s1013_s1 + $0x18] sm:$0xf] }
  0x81   : > { %v593_v16 = vsel %vm592_vm4, %v568_v8, %v582_v12  ;;  %v595_v17 = vsel %vm594_vm5, %v583_v13, %v584_v14  ;;  %v579_v38 = vperm.slane %v565_v35, 3  ;;  %v576_v40 = vperm.slane %v565_v35, 0 }
  0x82   : > { %v597_v18 = vsel %vm596_vm6, %v593_v16, %v595_v17  ;;  %v598_v28 = vsel %vm592_vm4, %v572_v24, %v585_v25  ;;  %v599_v29 = vsel %vm594_vm5, %v586_v26, %v587_v27  ;;  %v588_v41 = vrot.slane %v577_v36, 6 }
  0x83   : > { %v609_v19 = vmul.f32 %v597_v18, %v560_v15  ;;  %v600_v32 = vsel %vm596_vm6, %v598_v28, %v599_v29  ;;  %v589_v42 = vrot.slane %v578_v37, 4  ;;  %v590_v43 = vrot.slane %v579_v38, 2 }
  0x84   : > { %v610_v33 = vmul.f32 %v600_v32, %v561_v31  ;;  %v601_v44 = vsel %vm592_vm4, %v576_v40, %v588_v41  ;;  %v581_v57 = vperm.slane %v565_v35, 5  ;;  %v580_v59 = vperm.slane %v565_v35, 4 }
  0x85   : > { %616 = vst [vmem:[#allocation1] ss:$4 sm:$0xff] %v609_v19  ;;  %v602_v45 = vsel %vm594_vm5, %v589_v42, %v590_v43  ;;  %v614_v52 = vadd.f32 %v613_v50, %v609_v19  ;;  %vm661_vm7 = vcmask 523264  }
  0x86   : > { %v603_v48 = vsel %vm596_vm6, %v601_v44, %v602_v45  ;;  %v591_v60 = vrot.slane %v581_v57, 6 }
  0x87   : > { %v611_v49 = vmul.f32 %v603_v48, %v562_v47 }
  0x88   : > { %v604_v1 = vsel %vm592_vm4, %v580_v59, %v591_v60 }
  0x89   : > { %v612_v3 = vmul.f32 %v604_v1, %v563_v0 }
  0x8c   : > { %v617_v23 = vld.sshfl [vmem:[#allocation1 + $0x8] sm:$0xff pattern:$0x73625140] }
  0x8d   : > { %620 = vst [vmem:[#allocation1] ss:$4 sm:$0xff] %v609_v19  ;;  %v619_v53 = vadd.f32 %v617_v23, %v614_v52 }
  0x94   : > { %v621_v30 = vld.sshfl [vmem:[#allocation1 + $0x10] sm:$0xff pattern:$0x73625140] }
  0x95   : > { %624 = vst [vmem:[#allocation1] ss:$4 sm:$0xff] %v609_v19  ;;  %v623_v54 = vadd.f32 %v621_v30, %v619_v53 }
  0x9c   : > { %v625_v34 = vld.sshfl [vmem:[#allocation1 + $0x18] sm:$0xff pattern:$0x73625140] }
  0x9d   : > { %630 = vst [vmem:[#allocation1] ss:$4 sm:$0xff] %v610_v33  ;;  %v627_v56 = vadd.f32 %v625_v34, %v623_v54 }
  0x9f   : > { %v628_v58 = vadd.f32 %v627_v56, %v610_v33 }
  0xa4   : > { %v631_v39 = vld.sshfl [vmem:[#allocation1 + $0x8] sm:$0xff pattern:$0x73625140] }
  0xa5   : > { %634 = vst [vmem:[#allocation1] ss:$4 sm:$0xff] %v610_v33  ;;  %v633_v61 = vadd.f32 %v631_v39, %v628_v58 }
  0xac   : > { %v635_v46 = vld.sshfl [vmem:[#allocation1 + $0x10] sm:$0xff pattern:$0x73625140] }
  0xad   : > { %638 = vst [vmem:[#allocation1] ss:$4 sm:$0xff] %v610_v33  ;;  %v637_v63 = vadd.f32 %v635_v46, %v633_v61 }
  0xb4   : > { %v639_v51 = vld.sshfl [vmem:[#allocation1 + $0x18] sm:$0xff pattern:$0x73625140] }
  0xb5   : > { %644 = vst [vmem:[#allocation1] ss:$4 sm:$0xff] %v611_v49  ;;  %v641_v2 = vadd.f32 %v639_v51, %v637_v63 }
  0xb7   : > { %v642_v4 = vadd.f32 %v641_v2, %v611_v49 }
  0xbc   : > { %v645_v55 = vld.sshfl [vmem:[#allocation1 + $0x8] sm:$0xff pattern:$0x73625140] }
  0xbd   : > { %648 = vst [vmem:[#allocation1] ss:$4 sm:$0xff] %v611_v49  ;;  %v647_v6 = vadd.f32 %v645_v55, %v642_v4 }
  0xc4   : > { %v649_v62 = vld.sshfl [vmem:[#allocation1 + $0x10] sm:$0xff pattern:$0x73625140] }
  0xc5   : > { %652 = vst [vmem:[#allocation1] ss:$4 sm:$0xff] %v611_v49  ;;  %v651_v7 = vadd.f32 %v649_v62, %v647_v6 }
  0xcc   : > { %v653_v5 = vld.sshfl [vmem:[#allocation1 + $0x18] sm:$0xff pattern:$0x73625140] }
  0xcd   : > { %658 = vst [vmem:[#allocation1] ss:$4 sm:$0xff] %v612_v3  ;;  %v655_v8 = vadd.f32 %v653_v5, %v651_v7 }
  0xcf   : > { %v656_v9 = vadd.f32 %v655_v8, %v612_v3 }
  0xd4   : > { %v659_v10 = vld.sshfl [vmem:[#allocation1 + $0x8] sm:$0xff pattern:$0x73625140] }
  0xd5   : > { %v662_v11 = vsel %vm661_vm7, %v659_v10, 0.0 }
  0xd6   : > { %v663_v12 = vadd.f32 %v662_v11, %v656_v9 }
  0xd8   : > { %664 = vst [vmem:[#allocation2] sm:$0x3] %v663_v12 }
  0xd9 PF: > { %vm669_vm8 = vcmask 1041408   ;;  %vm673_vm9 = vcmask 1024  }
  0xdf   : > { %v668_v13 = vld [vmem:[#allocation2] sm:$0x3] }
  0xe0   : > { %v670_v14 = vsel %vm669_vm8, %v668_v13, 0.0 }
  0xe1   : > { %671 = vadd.xlane.f32.xlu0 %v670_v14 }
 0x154   : > { %v672_v15 = vpop.xlane.xlu0 %671 }
 0x155   : > { %674 = vst.msk [vmem:[%s940_s25] sm:$0x3] %vm673_vm9, %v672_v15 }
 0x156 PF: > { %s14_s17 = sadd.s32 1, %s885_s17   ;;  %s1017_s15 = smov %s881_s16 }
 0x157   : > { %p11_p10 = scmp.ge.s32.totalorder %s14_s17, 4   ;;  %s1018_s16 = smov %s1020_s18 }
 0x159   :  { %13 = sbr.rel (!%p11_p10) target bundleno = 2 (0x2), region = 91 }

</bundles_post_ra>
